<compile_context>
chip_gen: v7x
topology: tpu7x:2x2x1
jax: 0.10.0
libtpu: 0.0.40
codegen_flags: <defaults>
</compile_context>

<pallas_src>
import jax
import jax.numpy as jnp
from jax.experimental import pallas as pl
from jax.experimental.pallas import tpu as pltpu

BN_EPS = 1e-5


def lp_block_kernel(x_ref, w_ref, b_ref, gamma_ref, beta_ref, o_ref):
    # Linear: x (N, K) against weight (tm, K) in PyTorch layout.
    # Contract K of both operands -> (N, tm); accumulate in f32 on the MXU.
    y = jax.lax.dot_general(
        x_ref[...],
        w_ref[...],
        dimension_numbers=(((1,), (1,)), ((), ())),
        preferred_element_type=jnp.float32,
    )
    y = y + b_ref[...]  # (N, tm) + (1, tm)

    # BatchNorm1d training-mode normalization: batch statistics over the row
    # (batch) axis, biased variance (divide by N), eps inside rsqrt.
    inv_n = jnp.float32(1.0 / y.shape[0])
    mean = jnp.sum(y, axis=0, keepdims=True) * inv_n
    centered = y - mean
    var = jnp.sum(centered * centered, axis=0, keepdims=True) * inv_n

    # Fold gamma into the inv-std (saves one (N, tm) multiply).
    scale = gamma_ref[...] * jax.lax.rsqrt(var + BN_EPS)
    out = centered * scale + beta_ref[...]

    # ReLU + store (lane-dense, unmasked vst because tm % 128 == 0).
    o_ref[...] = jnp.maximum(out, 0.0).astype(o_ref.dtype)


def lp_block(x, weight, bias, gamma, beta, *, tm=128, use_bf16=False):
    """x: (N, K) f32; weight: (M, K) f32 (PyTorch layout); bias/gamma/beta: (M,)."""
    n, k = x.shape
    m = weight.shape[0]

    assert tm % 128 == 0, "feature tile must be lane-dense (multiple of 128)"
    m_pad = ((m + tm - 1) // tm) * tm
    grid_m = m_pad // tm

    # Pad the feature axis with zero weights/bias/affine so the kernel output
    # is lane-dense; padded columns compute to 0 and are sliced off below.
    if m_pad != m:
        weight = jnp.pad(weight, ((0, m_pad - m), (0, 0)))
        bias = jnp.pad(bias, (0, m_pad - m))
        gamma = jnp.pad(gamma, (0, m_pad - m))
        beta = jnp.pad(beta, (0, m_pad - m))

    if use_bf16:
        # bf16 matmul inputs, f32 accumulation (v6e/v7x MXU fast path).
        x_in = x.astype(jnp.bfloat16)
        w_in = weight.astype(jnp.bfloat16)
    else:
        x_in = x
        w_in = weight

    b2 = bias.reshape(1, m_pad).astype(jnp.float32)
    g2 = gamma.reshape(1, m_pad).astype(jnp.float32)
    be2 = beta.reshape(1, m_pad).astype(jnp.float32)

    out_padded = pl.pallas_call(
        lp_block_kernel,
        out_shape=jax.ShapeDtypeStruct((n, m_pad), jnp.float32),
        grid_spec=pltpu.PrefetchScalarGridSpec(
            num_scalar_prefetch=0,
            grid=(grid_m,),
            in_specs=[
                # x: same block for every grid step -> stays resident in VMEM.
                pl.BlockSpec((n, k), lambda j: (0, 0)),
                # weight tile (tm, K) in PyTorch layout, marches along M.
                pl.BlockSpec((tm, k), lambda j: (j, 0)),
                pl.BlockSpec((1, tm), lambda j: (0, j)),
                pl.BlockSpec((1, tm), lambda j: (0, j)),
                pl.BlockSpec((1, tm), lambda j: (0, j)),
            ],
            out_specs=pl.BlockSpec((n, tm), lambda j: (0, j)),
        ),
        compiler_params=pltpu.CompilerParams(
            # Feature tiles are fully independent (BN stats are per-feature):
            # shard across TensorCores on v7x; harmless on v5e/v6e.
            dimension_semantics=("parallel",),
        ),
    )(x_in, w_in, b2, g2, be2)

    return out_padded[:, :m] if m_pad != m else out_padded


def lp_block_ref(x, weight, bias, gamma, beta):
    y = x @ weight.T + bias
    mean = jnp.mean(y, axis=0, keepdims=True)
    var = jnp.mean((y - mean) ** 2, axis=0, keepdims=True)
    y_hat = (y - mean) / jnp.sqrt(var + BN_EPS)
    return jnp.maximum(y_hat * gamma + beta, 0.0)


if __name__ == "__main__":
    # Small shapes: batch=8, input_size=32, output_size=32
    N, K, M = 8, 32, 32
    key = jax.random.PRNGKey(0)
    kx, kw, kb = jax.random.split(key, 3)

    x = jax.random.normal(kx, (N, K), dtype=jnp.float32)

    # Deterministic parameter init mimicking PyTorch defaults:
    #   Linear: weight, bias ~ U(-1/sqrt(K), 1/sqrt(K))
    #   BatchNorm1d: gamma = 1, beta = 0
    bound = 1.0 / jnp.sqrt(jnp.float32(K))
    weight = jax.random.uniform(kw, (M, K), jnp.float32, -bound, bound)
    bias = jax.random.uniform(kb, (M,), jnp.float32, -bound, bound)
    gamma = jnp.ones((M,), jnp.float32)
    beta = jnp.zeros((M,), jnp.float32)

    out = lp_block(x, weight, bias, gamma, beta)
    jax.block_until_ready(out)

    ref = lp_block_ref(x, weight, bias, gamma, beta)
    assert out.shape == (N, M)
    assert jnp.allclose(out, ref, atol=1e-4, rtol=1e-4)
    print("KERNEL_OK")
</pallas_src>

<mosaic_0001>
module attributes {stable_mosaic.version = 11 : i64} {
  func.func @lp_block_kernel(%arg0: i32, %arg1: memref<8x32xf32, #tpu.memory_space<vmem>>, %arg2: memref<128x32xf32, #tpu.memory_space<vmem>>, %arg3: memref<1x128xf32, #tpu.memory_space<vmem>>, %arg4: memref<1x128xf32, #tpu.memory_space<vmem>>, %arg5: memref<1x128xf32, #tpu.memory_space<vmem>>, %arg6: memref<8x128xf32, #tpu.memory_space<vmem>>) attributes {dimension_semantics = [#tpu.dimension_semantics<parallel>], iteration_bounds = array<i64: 1>, scalar_prefetch = 0 : i64, scratch_operands = 0 : i64, tpu.core_type = #tpu.core_type<tc>, window_params = [{pipeline_mode = #tpu.pipeline_mode<synchronous>, transform_indices = @transform_0, window_bounds = array<i64: 8, 32>}, {transform_indices = @transform_1, window_bounds = array<i64: 128, 32>}, {transform_indices = @transform_2, window_bounds = array<i64: 1, 128>}, {transform_indices = @transform_3, window_bounds = array<i64: 1, 128>}, {transform_indices = @transform_4, window_bounds = array<i64: 1, 128>}, {transform_indices = @transform_5, window_bounds = array<i64: 8, 128>}]} {
    %c0 = arith.constant 0 : index
    %c0_0 = arith.constant 0 : index
    %0 = vector.load %arg1[%c0, %c0_0] : memref<8x32xf32, #tpu.memory_space<vmem>>, vector<8x32xf32>
    %c0_1 = arith.constant 0 : index
    %c0_2 = arith.constant 0 : index
    %1 = vector.load %arg2[%c0_1, %c0_2] : memref<128x32xf32, #tpu.memory_space<vmem>>, vector<128x32xf32>
    %cst = arith.constant dense<0.000000e+00> : vector<8x128xf32>
    %2 = tpu.matmul %0, %1, %cst {dimension_numbers = #tpu.dot_dimension_numbers<[1], [1], [0], [0], [0, 0, 1, 0], [], []>} : vector<8x32xf32>, vector<128x32xf32>, vector<8x128xf32> -> vector<8x128xf32>
    %c0_3 = arith.constant 0 : index
    %c0_4 = arith.constant 0 : index
    %3 = vector.load %arg3[%c0_3, %c0_4] : memref<1x128xf32, #tpu.memory_space<vmem>>, vector<1x128xf32>
    %4 = vector.broadcast %3 : vector<1x128xf32> to vector<8x128xf32>
    %5 = arith.addf %2, %4 : vector<8x128xf32>
    %cst_5 = arith.constant dense<0.000000e+00> : vector<128xf32>
    %6 = vector.multi_reduction <add>, %5, %cst_5 [0] : vector<8x128xf32> to vector<128xf32>
    %7 = vector.shape_cast %6 : vector<128xf32> to vector<1x128xf32>
    %cst_6 = arith.constant 1.250000e-01 : f32
    %8 = vector.broadcast %cst_6 : f32 to vector<1x128xf32>
    %9 = arith.mulf %7, %8 : vector<1x128xf32>
    %10 = vector.broadcast %9 : vector<1x128xf32> to vector<8x128xf32>
    %11 = arith.subf %5, %10 : vector<8x128xf32>
    %12 = arith.mulf %11, %11 : vector<8x128xf32>
    %cst_7 = arith.constant dense<0.000000e+00> : vector<128xf32>
    %13 = vector.multi_reduction <add>, %12, %cst_7 [0] : vector<8x128xf32> to vector<128xf32>
    %14 = vector.shape_cast %13 : vector<128xf32> to vector<1x128xf32>
    %cst_8 = arith.constant 1.250000e-01 : f32
    %15 = vector.broadcast %cst_8 : f32 to vector<1x128xf32>
    %16 = arith.mulf %14, %15 : vector<1x128xf32>
    %c0_9 = arith.constant 0 : index
    %c0_10 = arith.constant 0 : index
    %17 = vector.load %arg4[%c0_9, %c0_10] : memref<1x128xf32, #tpu.memory_space<vmem>>, vector<1x128xf32>
    %cst_11 = arith.constant 9.99999974E-6 : f32
    %18 = vector.broadcast %cst_11 : f32 to vector<1x128xf32>
    %19 = arith.addf %16, %18 : vector<1x128xf32>
    %20 = math.rsqrt %19 : vector<1x128xf32>
    %21 = arith.mulf %17, %20 : vector<1x128xf32>
    %22 = vector.broadcast %21 : vector<1x128xf32> to vector<8x128xf32>
    %23 = arith.mulf %11, %22 : vector<8x128xf32>
    %c0_12 = arith.constant 0 : index
    %c0_13 = arith.constant 0 : index
    %24 = vector.load %arg5[%c0_12, %c0_13] : memref<1x128xf32, #tpu.memory_space<vmem>>, vector<1x128xf32>
    %25 = vector.broadcast %24 : vector<1x128xf32> to vector<8x128xf32>
    %26 = arith.addf %23, %25 : vector<8x128xf32>
    %cst_14 = arith.constant 0.000000e+00 : f32
    %27 = vector.broadcast %cst_14 : f32 to vector<8x128xf32>
    %28 = arith.maximumf %26, %27 : vector<8x128xf32>
    %c0_15 = arith.constant 0 : index
    %c0_16 = arith.constant 0 : index
    %29 = vector.load %arg6[%c0_15, %c0_16] : memref<8x128xf32, #tpu.memory_space<vmem>>, vector<8x128xf32>
    tpu.vector_store %arg6[%c0_15, %c0_16], %28 {strides = array<i32>} : memref<8x128xf32, #tpu.memory_space<vmem>>, vector<8x128xf32>,
    return
  }
  func.func @transform_0(%arg0: i32) -> (i32, i32) {
    %c0_i32 = arith.constant 0 : i32
    %c0_i32_0 = arith.constant 0 : i32
    %c0_i32_1 = arith.constant 0 : i32
    return %c0_i32, %c0_i32_0 : i32, i32
  }
  func.func @transform_1(%arg0: i32) -> (i32, i32) {
    %c0_i32 = arith.constant 0 : i32
    %c0_i32_0 = arith.constant 0 : i32
    return %arg0, %c0_i32 : i32, i32
  }
  func.func @transform_2(%arg0: i32) -> (i32, i32) {
    %c0_i32 = arith.constant 0 : i32
    %c0_i32_0 = arith.constant 0 : i32
    return %c0_i32, %arg0 : i32, i32
  }
  func.func @transform_3(%arg0: i32) -> (i32, i32) {
    %c0_i32 = arith.constant 0 : i32
    %c0_i32_0 = arith.constant 0 : i32
    return %c0_i32, %arg0 : i32, i32
  }
  func.func @transform_4(%arg0: i32) -> (i32, i32) {
    %c0_i32 = arith.constant 0 : i32
    %c0_i32_0 = arith.constant 0 : i32
    return %c0_i32, %arg0 : i32, i32
  }
  func.func @transform_5(%arg0: i32) -> (i32, i32) {
    %c0_i32 = arith.constant 0 : i32
    %c0_i32_0 = arith.constant 0 : i32
    return %c0_i32, %arg0 : i32, i32
  }
}

</mosaic_0001>

<bundles_post_ra>
// kernel: tpu_custom_call.1
= control target key start
LH: loop header
LB: loop body
LE: loop exit
PB: predicated region body
PF: predicated region fallthrough
CT: control target
= control target key end

     0   :  { %vm45_vm0 = vcmask 261120   ;;  %v351_v2 = vmov 0.0|0.0   ;;  %vm352_vm2 = vmmov 0   ;;  %v353_v5 = vmov 0.0   ;;  %s480_s0 = inlined_call_operand.vmem [shape: f32[8,32], index: 0, kind: input, shape index: {}]   ;;  %s481_s1 = inlined_call_operand.vmem [shape: f32[128,32], index: 1, kind: input, shape index: {}]   ;;  %s482_s2 = inlined_call_operand.vmem [shape: f32[1,128], index: 2, kind: input, shape index: {}]   ;;  %s483_s3 = inlined_call_operand.vmem [shape: f32[1,128], index: 3, kind: input, shape index: {}]   ;;  %s484_s4 = inlined_call_operand.vmem [shape: f32[1,128], index: 4, kind: input, shape index: {}]   ;;  %s485_s5 = inlined_call_operand.hbm [shape: f32[8,128], index: 5, kind: output, shape index: {}]  }
   0x1   :  { %v22_v0 = vld [vmem:[%s481_s1] sm:$0xff]  ;;  %v23_v1 = vld [vmem:[%s481_s1 + $0x8] sm:$0xff]  ;;  %289 = vmatprep.subr.bf16.mxu0 %v351_v2  ;;  %vm393_vm1 = vmpackc.low %vm45_vm0, %vm45_vm0  ;;  %286 = vmatprep.mubr.msk.f32.mxu0 %vm352_vm2, %v353_v5 }
   0x2   :  { %v290_v3 = vpack.c.bf16 %v23_v1, %v22_v0  ;;  %v24_v6 = vld [vmem:[%s481_s1 + $0x10] sm:$0xff]  ;;  %v25_v7 = vld [vmem:[%s481_s1 + $0x18] sm:$0xff] }
   0x4   :  { %292 = vmatpush3.bf16.xpose.msk.msra.mxu0 %vm393_vm1, %v290_v3 }
   0x5   :  { %293 = vmatprep.subr.bf16.mxu0 %v351_v2 }
   0x6   :  { %10 = vsyncpa [#allocation3], 0  ;;  %v294_v8 = vpack.c.bf16 %v25_v7, %v24_v6  ;;  %v26_v9 = vld [vmem:[%s481_s1 + $0x20] sm:$0xff]  ;;  %v27_v10 = vld [vmem:[%s481_s1 + $0x28] sm:$0xff]  ;;  %v188_v49 = vlaneseq  ;;  %s354_s30 = smov [#allocation2]  }
   0x7   :  { %v298_v11 = vpack.c.bf16 %v27_v10, %v26_v9  ;;  %v28_v12 = vld [vmem:[%s481_s1 + $0x30] sm:$0xff]  ;;  %v29_v13 = vld [vmem:[%s481_s1 + $0x38] sm:$0xff]  ;;  %v30_v15 = vld [vmem:[%s481_s1 + $0x40] sm:$0xff]  ;;  %s210_s6 = sshll.u32 %s354_s30, 4  ;;  %s211_s6 = int_to_ptr.vmem [resolvable:$true] %s210_s6 }
   0x8   :  { %v302_v14 = vpack.c.bf16 %v29_v13, %v28_v12  ;;  %v31_v16 = vld [vmem:[%s481_s1 + $0x48] sm:$0xff]  ;;  %v32_v18 = vld [vmem:[%s481_s1 + $0x50] sm:$0xff]  ;;  %v33_v19 = vld [vmem:[%s481_s1 + $0x58] sm:$0xff]  ;;  %v189_v50 = vshrl.u32 %v188_v49, 7  ;;  %s327_s7 = scalar_lea.vmem %s211_s6, 128  ;;  %p332_p1 = scmp.lt.s32.totalorder %s211_s6, %s211_s6 }
   0x9   :  { %v306_v17 = vpack.c.bf16 %v31_v16, %v30_v15  ;;  %v310_v20 = vpack.c.bf16 %v33_v19, %v32_v18  ;;  %v34_v21 = vld [vmem:[%s481_s1 + $0x60] sm:$0xff]  ;;  %v35_v22 = vld [vmem:[%s481_s1 + $0x68] sm:$0xff]  ;;  %v36_v24 = vld [vmem:[%s481_s1 + $0x70] sm:$0xff]  ;;  %p328_p0 = scmp.ne.s32.totalorder %s211_s6, %s327_s7  ;;  %p333_p2 = scmp.lt.s32.totalorder %s327_s7, %s327_s7 }
   0xa   :  { %v314_v23 = vpack.c.bf16 %v35_v22, %v34_v21  ;;  %v37_v25 = vld [vmem:[%s481_s1 + $0x78] sm:$0xff]  ;;  %v21_v27 = vld [vmem:[%s480_s0] sm:$0xff]  ;;  %v190_v52 = vsub.s32 0, %v189_v50 }
   0xb   :  { %v318_v26 = vpack.c.bf16 %v37_v25, %v36_v24  ;;  %v218_v28 = vld [vmem:[%s482_s2] ss:$0 sm:$0xff]  ;;  %p334_p3 = por %p333_p2, %p332_p1 }
   0xc   :  { %296 = vmatpush3.bf16.xpose.msk.msra.mxu0 %vm393_vm1, %v294_v8  ;;  %v183_v51 = vld [vmem:[%s483_s3] sm:$0x1] }
   0xd   :  { %297 = vmatprep.subr.bf16.mxu0 %v351_v2  ;;  %v236_v56 = vld [vmem:[%s484_s4] ss:$0 sm:$0xff]  ;;  %p335_p4 = pnand %p334_p3, %p328_p0 }
  0x14   :  { %300 = vmatpush3.bf16.xpose.msk.msra.mxu0 %vm393_vm1, %v298_v11 }
  0x15   :  { %301 = vmatprep.subr.bf16.mxu0 %v351_v2 }
  0x1c   :  { %304 = vmatpush3.bf16.xpose.msk.msra.mxu0 %vm393_vm1, %v302_v14 }
  0x1d   :  { %305 = vmatprep.subr.bf16.mxu0 %v351_v2 }
  0x24   :  { %308 = vmatpush3.bf16.xpose.msk.msra.mxu0 %vm393_vm1, %v306_v17 }
  0x25   :  { %309 = vmatprep.subr.bf16.mxu0 %v351_v2 }
  0x2c   :  { %312 = vmatpush3.bf16.xpose.msk.msra.mxu0 %vm393_vm1, %v310_v20 }
  0x2d   :  { %313 = vmatprep.subr.bf16.mxu0 %v351_v2 }
  0x34   :  { %316 = vmatpush3.bf16.xpose.msk.msra.mxu0 %vm393_vm1, %v314_v23 }
  0x35   :  { %317 = vmatprep.subr.bf16.mxu0 %v351_v2 }
  0x3c   :  { %320 = vmatpush3.bf16.xpose.msk.msra.mxu0 %vm393_vm1, %v318_v26 }
  0x43   :  { %287 = vmatmul.mubr.msk.f32.vlgmr.msra.gmra.mrb[0].mxu0 %vm45_vm0, %v21_v27 }
 0x116   :  { %v163_v29 = vpop.f32.mrb[0].mxu0 }
 0x117   :  { %v164_v30 = vadd.f32 %v218_v28, %v163_v29  ;;  %v288_v31 = vpop.f32.mrb[1].mxu0 }
 0x119   :  { %v167_v32 = vrot.slane %v164_v30, 4 }
 0x11b   :  { %v168_v33 = vadd.f32 %v167_v32, %v164_v30 }
 0x11d   :  { %v169_v34 = vrot.slane %v168_v33, 2 }
 0x11f   :  { %v170_v35 = vadd.f32 %v169_v34, %v168_v33 }
 0x121   :  { %v171_v36 = vrot.slane %v170_v35, 1 }
 0x123   :  { %v172_v37 = vadd.f32 %v171_v36, %v170_v35 }
 0x125   :  { %v173_v38 = vmul.f32 0.125, %v172_v37 }
 0x127   :  { %v174_v39 = vsub.f32 %v164_v30, %v173_v38 }
 0x129   :  { %v175_v40 = vmul.f32 %v174_v39, %v174_v39 }
 0x12b   :  { %v176_v41 = vrot.slane %v175_v40, 4 }
 0x12d   :  { %v177_v42 = vadd.f32 %v176_v41, %v175_v40 }
 0x12f   :  { %v178_v43 = vrot.slane %v177_v42, 2 }
 0x131   :  { %v179_v44 = vadd.f32 %v178_v43, %v177_v42 }
 0x133   :  { %v180_v45 = vrot.slane %v179_v44, 1 }
 0x135   :  { %v181_v46 = vadd.f32 %v180_v45, %v179_v44 }
 0x137   :  { %v182_v47 = vmul.f32 0.125, %v181_v46 }
 0x139   :  { %v184_v48 = vadd.f32 1e-05, %v182_v47 }
 0x13b   :  { %325 = vrsqrt.f32 %v184_v48 }
 0x145   :  { %v326_v53 = vpop.eup %325 }
 0x146   :  { %v186_v54 = vmul.f32 %v326_v53, %v183_v51 }
 0x148   :  { %v191_v55 = vrot.slane %v186_v54, %v190_v52 }
 0x14a   :  { %v193_v57 = vmul.f32 %v191_v55, %v174_v39 }
 0x14c   :  { %v201_v58 = vadd.f32 %v236_v56, %v193_v57 }
 0x14e   :  { %v202_v59 = vmax.f32 %v201_v58, 0.0 }
 0x150   :  { %203 = vst [vmem:[#allocation2] sm:$0xff] %v202_v59 }
 0x151   :  { %338 = shalt.err (!%p335_p4)
}
 0x152   :  { %s339_s9 = scalar_lea.hbm %s485_s5, 128 }
 0x153   :  { %p340_p5 = scmp.ne.s32.totalorder %s485_s5, %s339_s9  ;;  %p343_p6 = scmp.lt.u32.totalorder %s339_s9, %s485_s5 }
 0x155   :  { %p345_p7 = pnand %p343_p6, %p340_p5 }
 0x157   :  { %348 = shalt.err (!%p345_p7)
}
 0x158   :  { %213 = dma.vmem_to_hbm [thread:$0]  %s211_s6, 128, %s485_s5, [#allocation3]  }
 0x159   :  { %349 = dma.done.wait [#allocation3], 128  }
 0x15a   :  { %350 = vsyncadd [#allocation3], 4294967168 }
 0x15b   :  { %217 = vsyncpa [#allocation3], 1 }

</bundles_post_ra>
